<compile_context>
chip_gen: v7x
topology: tpu7x:2x2x1
jax: 0.10.0
libtpu: 0.0.40
codegen_flags: <defaults>
</compile_context>

<pallas_src>
import math

import jax
import jax.numpy as jnp
import numpy as np
from jax.experimental import pallas as pl
from jax.experimental.pallas import tpu as pltpu


def _round_up(n: int, m: int) -> int:
    return ((n + m - 1) // m) * m


def _make_linear_kernel(pack: int, dim: int):
    """Kernel over a packed x tile of shape (rows, pack * dim).

    Each packed row holds `pack` consecutive batch rows of `dim` features.
    Output tile is (rows, pack): column j is the dot product of lane segment
    j with the weight row, plus bias.  pack == 1 is the unpacked fallback.
    All compute is VPU/XLU (elementwise multiply + lane reductions); the MXU
    is never touched.
    """

    def kernel(x_ref, w_ref, b_ref, o_ref):
        # x_ref: (TB, pack*dim) f32 VMEM   w_ref: (1, pack*dim) f32 VMEM
        # b_ref: (1, 1) f32 SMEM           o_ref: (TB, pack) f32 VMEM
        prod = x_ref[...] * w_ref[...]          # VPU, broadcast over sublanes
        b = b_ref[0, 0]
        for j in range(pack):                   # static unroll (pack is small)
            seg = prod[:, j * dim:(j + 1) * dim]
            o_ref[:, j:j + 1] = jnp.sum(seg, axis=1, keepdims=True) + b

    return kernel


def _pick_block_rows(rows: int, packed_width: int) -> int:
    """Rows of the packed x array processed per grid step.

    Targets ~4 MiB of x per tile (2x-buffered -> 8 MiB, inside every
    generation's scoped-VMEM default), a multiple of 8 rows, capped so that
    large batches get >= ~8 grid steps.
    """
    if rows <= 8:
        return rows
    vmem_row_bytes = _round_up(packed_width, 128) * 4      # f32, lane-padded
    tb = max(8, (4 * 1024 * 1024) // vmem_row_bytes)
    tb = (tb // 8) * 8
    tb = min(tb, _round_up(pl.cdiv(rows, 8), 8))            # >= ~8 grid steps
    return max(8, min(tb, _round_up(rows, 8)))


def logistic_regression_forward(x, weight, bias, *, block_rows=None):
    """x: (B, D) f32; weight: (1, D) (PyTorch nn.Linear layout); bias: (1,).

    Returns (B, 1) f32 == nn.Linear(input_dim, 1)(x), computed in exact f32.
    """
    B, D = x.shape
    x = x.astype(jnp.float32)
    w_row = weight.astype(jnp.float32).reshape(1, D)
    b2 = bias.astype(jnp.float32).reshape(1, 1)

    # Lane packing: fold `pack` batch rows into one 128-lane row when the
    # reshape is free (contiguous, no pad copy).  Otherwise fall back to the
    # unpacked (B, D) layout rather than jnp.pad-copying the whole input.
    pack = 128 // D if (1 <= D <= 128 and 128 % D == 0) else 1
    if pack > 1 and B % pack != 0:
        pack = 1
    packed_width = pack * D
    rows = B // pack

    xp = x.reshape(rows, packed_width)                      # free: contiguous
    wp = jnp.tile(w_row, (1, pack)) if pack > 1 else w_row  # (1, packed_width)

    tb = block_rows if block_rows is not None else _pick_block_rows(
        rows, packed_width)
    grid = (pl.cdiv(rows, tb),)

    out = pl.pallas_call(
        _make_linear_kernel(pack, D),
        out_shape=jax.ShapeDtypeStruct((rows, pack), jnp.float32),
        grid=grid,
        in_specs=[
            pl.BlockSpec((tb, packed_width), lambda i: (i, 0)),   # x streams
            pl.BlockSpec((1, packed_width), lambda i: (0, 0)),    # w resident
            pl.BlockSpec(memory_space=pltpu.MemorySpace.SMEM),    # bias scalar
        ],
        out_specs=pl.BlockSpec((tb, pack), lambda i: (i, 0)),
        compiler_params=pltpu.CompilerParams(
            dimension_semantics=("parallel",),
        ),
    )(xp, wp, b2)

    return out.reshape(B, 1)


if __name__ == "__main__":
    key = jax.random.PRNGKey(0)
    k_w, k_b, k_x1, k_x2, k_x3 = jax.random.split(key, 5)

    input_dim = 32
    bound = 1.0 / math.sqrt(input_dim)   # nn.Linear default init range
    weight = jax.random.uniform(k_w, (1, input_dim), jnp.float32, -bound, bound)
    bias = jax.random.uniform(k_b, (1,), jnp.float32, -bound, bound)

    w64 = np.asarray(weight, dtype=np.float64)
    b64 = np.asarray(bias, dtype=np.float64)

    def check(x, out):
        ref = np.asarray(x, dtype=np.float64) @ w64.T + b64
        assert out.shape == (x.shape[0], 1)
        np.testing.assert_allclose(np.asarray(out, dtype=np.float64), ref,
                                   atol=1e-5, rtol=1e-5)

    # Case 1: small batch, packed path (pack = 128 // 32 = 4), single step.
    x1 = jax.random.normal(k_x1, (8, input_dim), jnp.float32)
    out1 = jax.block_until_ready(logistic_regression_forward(x1, weight, bias))
    check(x1, out1)

    # Case 2: batch not divisible by the pack factor -> unpacked fallback
    # with a partial trailing block (no jnp.pad copy).
    x2 = jax.random.normal(k_x2, (10, input_dim), jnp.float32)
    out2 = jax.block_until_ready(logistic_regression_forward(x2, weight, bias))
    check(x2, out2)

    # Case 3: packed path, multiple grid steps, partial trailing block.
    x3 = jax.random.normal(k_x3, (1000, input_dim), jnp.float32)
    out3 = jax.block_until_ready(
        logistic_regression_forward(x3, weight, bias, block_rows=64))
    check(x3, out3)

    print("KERNEL_OK")
</pallas_src>

<mosaic_0001>
module attributes {stable_mosaic.version = 11 : i64} {
  func.func @kernel(%arg0: i32, %arg1: memref<2x128xf32, #tpu.memory_space<vmem>>, %arg2: memref<1x128xf32, #tpu.memory_space<vmem>>, %arg3: memref<1x1xf32, #tpu.memory_space<smem>>, %arg4: memref<2x4xf32, #tpu.memory_space<vmem>>) attributes {dimension_semantics = [#tpu.dimension_semantics<parallel>], iteration_bounds = array<i64: 1>, scalar_prefetch = 0 : i64, scratch_operands = 0 : i64, tpu.core_type = #tpu.core_type<tc>, window_params = [{transform_indices = @transform_0, window_bounds = array<i64: 2, 128>}, {pipeline_mode = #tpu.pipeline_mode<synchronous>, transform_indices = @transform_1, window_bounds = array<i64: 1, 128>}, {transform_indices = @transform_2, window_bounds = array<i64: 1, 1>}, {transform_indices = @transform_3, window_bounds = array<i64: 2, 4>}]} {
    %c0 = arith.constant 0 : index
    %c0_0 = arith.constant 0 : index
    %0 = vector.load %arg1[%c0, %c0_0] : memref<2x128xf32, #tpu.memory_space<vmem>>, vector<2x128xf32>
    %c0_1 = arith.constant 0 : index
    %c0_2 = arith.constant 0 : index
    %1 = vector.load %arg2[%c0_1, %c0_2] : memref<1x128xf32, #tpu.memory_space<vmem>>, vector<1x128xf32>
    %2 = vector.broadcast %1 : vector<1x128xf32> to vector<2x128xf32>
    %3 = arith.mulf %0, %2 : vector<2x128xf32>
    %c0_3 = arith.constant 0 : index
    %c0_4 = arith.constant 0 : index
    %4 = memref.load %arg3[%c0_3, %c0_4] : memref<1x1xf32, #tpu.memory_space<smem>>
    %5 = vector.extract_strided_slice %3 {offsets = [0, 0], sizes = [2, 32], strides = [1, 1]} : vector<2x128xf32> to vector<2x32xf32>
    %cst = arith.constant dense<0.000000e+00> : vector<2xf32>
    %6 = vector.multi_reduction <add>, %5, %cst [1] : vector<2x32xf32> to vector<2xf32>
    %7 = vector.shape_cast %6 : vector<2xf32> to vector<2x1xf32>
    %8 = vector.broadcast %4 : f32 to vector<2x1xf32>
    %9 = arith.addf %7, %8 : vector<2x1xf32>
    %c0_5 = arith.constant 0 : index
    %c0_6 = arith.constant 0 : index
    %10 = vector.load %arg4[%c0_5, %c0_6] : memref<2x4xf32, #tpu.memory_space<vmem>>, vector<2x1xf32>
    tpu.vector_store %arg4[%c0_5, %c0_6], %9 {strides = array<i32>} : memref<2x4xf32, #tpu.memory_space<vmem>>, vector<2x1xf32>,
    %11 = vector.extract_strided_slice %3 {offsets = [0, 32], sizes = [2, 32], strides = [1, 1]} : vector<2x128xf32> to vector<2x32xf32>
    %cst_7 = arith.constant dense<0.000000e+00> : vector<2xf32>
    %12 = vector.multi_reduction <add>, %11, %cst_7 [1] : vector<2x32xf32> to vector<2xf32>
    %13 = vector.shape_cast %12 : vector<2xf32> to vector<2x1xf32>
    %14 = vector.broadcast %4 : f32 to vector<2x1xf32>
    %15 = arith.addf %13, %14 : vector<2x1xf32>
    %c0_8 = arith.constant 0 : index
    %c1 = arith.constant 1 : index
    %16 = vector.load %arg4[%c0_8, %c1] : memref<2x4xf32, #tpu.memory_space<vmem>>, vector<2x1xf32>
    tpu.vector_store %arg4[%c0_8, %c1], %15 {strides = array<i32>} : memref<2x4xf32, #tpu.memory_space<vmem>>, vector<2x1xf32>,
    %17 = vector.extract_strided_slice %3 {offsets = [0, 64], sizes = [2, 32], strides = [1, 1]} : vector<2x128xf32> to vector<2x32xf32>
    %cst_9 = arith.constant dense<0.000000e+00> : vector<2xf32>
    %18 = vector.multi_reduction <add>, %17, %cst_9 [1] : vector<2x32xf32> to vector<2xf32>
    %19 = vector.shape_cast %18 : vector<2xf32> to vector<2x1xf32>
    %20 = vector.broadcast %4 : f32 to vector<2x1xf32>
    %21 = arith.addf %19, %20 : vector<2x1xf32>
    %c0_10 = arith.constant 0 : index
    %c2 = arith.constant 2 : index
    %22 = vector.load %arg4[%c0_10, %c2] : memref<2x4xf32, #tpu.memory_space<vmem>>, vector<2x1xf32>
    tpu.vector_store %arg4[%c0_10, %c2], %21 {strides = array<i32>} : memref<2x4xf32, #tpu.memory_space<vmem>>, vector<2x1xf32>,
    %23 = vector.extract_strided_slice %3 {offsets = [0, 96], sizes = [2, 32], strides = [1, 1]} : vector<2x128xf32> to vector<2x32xf32>
    %cst_11 = arith.constant dense<0.000000e+00> : vector<2xf32>
    %24 = vector.multi_reduction <add>, %23, %cst_11 [1] : vector<2x32xf32> to vector<2xf32>
    %25 = vector.shape_cast %24 : vector<2xf32> to vector<2x1xf32>
    %26 = vector.broadcast %4 : f32 to vector<2x1xf32>
    %27 = arith.addf %25, %26 : vector<2x1xf32>
    %c0_12 = arith.constant 0 : index
    %c3 = arith.constant 3 : index
    %28 = vector.load %arg4[%c0_12, %c3] : memref<2x4xf32, #tpu.memory_space<vmem>>, vector<2x1xf32>
    tpu.vector_store %arg4[%c0_12, %c3], %27 {strides = array<i32>} : memref<2x4xf32, #tpu.memory_space<vmem>>, vector<2x1xf32>,
    return
  }
  func.func @transform_0(%arg0: i32) -> (i32, i32) {
    %c0_i32 = arith.constant 0 : i32
    %c0_i32_0 = arith.constant 0 : i32
    return %arg0, %c0_i32 : i32, i32
  }
  func.func @transform_1(%arg0: i32) -> (i32, i32) {
    %c0_i32 = arith.constant 0 : i32
    %c0_i32_0 = arith.constant 0 : i32
    %c0_i32_1 = arith.constant 0 : i32
    return %c0_i32, %c0_i32_0 : i32, i32
  }
  func.func @transform_2(%arg0: i32) -> (i32, i32) {
    %c0_i32 = arith.constant 0 : i32
    %c0_i32_0 = arith.constant 0 : i32
    %c0_i32_1 = arith.constant 0 : i32
    return %c0_i32, %c0_i32_0 : i32, i32
  }
  func.func @transform_3(%arg0: i32) -> (i32, i32) {
    %c0_i32 = arith.constant 0 : i32
    %c0_i32_0 = arith.constant 0 : i32
    return %arg0, %c0_i32 : i32, i32
  }
}

</mosaic_0001>

<bundles_post_ra>
// kernel: tpu_custom_call.1
= control target key start
LH: loop header
LB: loop body
LE: loop exit
PB: predicated region body
PF: predicated region fallthrough
CT: control target
= control target key end

     0   :  { %s150_s0 = inlined_call_operand.vmem [shape: f32[2,128], index: 0, kind: input, shape index: {}]   ;;  %s151_s1 = inlined_call_operand.vmem [shape: f32[1,128], index: 1, kind: input, shape index: {}]   ;;  %s152_s2 = inlined_call_operand.<no memory space> [shape: f32[1,1], index: 2, kind: input, shape index: {}]   ;;  %s153_s3 = inlined_call_operand.hbm [shape: f32[2,4], index: 3, kind: output, shape index: {}]  }
   0x1   :  { %v16_v0 = vld [vmem:[%s150_s0] sm:$0x3] }
   0x2   :  { %v76_v1 = vld [vmem:[%s151_s1] ss:$0 sm:$0xff] }
   0x3   :  { %v24_v2 = vmul.f32 %v76_v1, %v16_v0 }
   0x4   :  { %9 = vsyncpa [#allocation4], 0  ;;  %s105_s16 = smov 96   ;;  %s106_s17 = smov 32   ;;  %vm26_vm0 = vcmask 254976   ;;  %v30_v10 = vstv %s152_s2  ;;  %vm32_vm1 = vcmask 1024  }
   0x5   :  { %35 = vrot.lane.b32.xlu0 %v24_v2, %s105_s16  ;;  %53 = vrot.lane.b32.xlu1 %v24_v2, %s106_s17  ;;  %s107_s18 = smov 64   ;;  %v27_v3 = vsel %vm26_vm0, %v24_v2, 0.0  ;;  %vm42_vm2 = vcmask 9224   ;;  %s108_s19 = smov [#allocation3]   ;;  %vm51_vm3 = vcmask 17424   ;;  %vm60_vm4 = vcmask 25624  }
   0x6   :  { %s68_s20 = sshll.u32 %s108_s19, 4  ;;  %s69_s20 = int_to_ptr.vmem [resolvable:$true] %s68_s20 }
   0x7   :  { %s81_s2 = scalar_lea.vmem %s69_s20, 32  ;;  %p86_p1 = scmp.lt.s32.totalorder %s69_s20, %s69_s20 }
   0x8   :  { %p82_p0 = scmp.ne.s32.totalorder %s69_s20, %s81_s2  ;;  %p87_p2 = scmp.lt.s32.totalorder %s81_s2, %s81_s2 }
   0x9   :  { %44 = vrot.lane.b32.xlu0 %v24_v2, %s107_s18 }
   0xa   :  { %p88_p3 = por %p87_p2, %p86_p1 }
   0xc   :  { %p89_p4 = pnand %p88_p3, %p82_p0 }
  0x29   :  { %28 = vadd.xlane.f32.xlu1 %v27_v3 }
  0x77   :  { %v36_v4 = vpop.permute.xlu0 %35  ;;  %v54_v5 = vpop.permute.xlu1 %53 }
  0x78   :  { %v38_v6 = vsel %vm26_vm0, %v36_v4, 0.0  ;;  %v56_v7 = vsel %vm26_vm0, %v54_v5, 0.0 }
  0x79   :  { %39 = vadd.xlane.f32.xlu0 %v38_v6  ;;  %57 = vadd.xlane.f32.xlu1 %v56_v7 }
  0x7b   :  { %v45_v8 = vpop.permute.xlu0 %44 }
  0x7c   :  { %v47_v9 = vsel %vm26_vm0, %v45_v8, 0.0 }
  0x7d   :  { %48 = vadd.xlane.f32.xlu0 %v47_v9 }
  0xb6   :  { %v29_v11 = vpop.xlane.xlu1 %28 }
  0xb7   :  { %v31_v12 = vadd.f32 %v30_v10, %v29_v11 }
  0xb9   :  { %33 = vst.msk [vmem:[#allocation3] sm:$0x3] %vm32_vm1, %v31_v12 }
 0x106   :  { %v40_v13 = vpop.xlane.xlu0 %39  ;;  %v58_v15 = vpop.xlane.xlu1 %57 }
 0x107   :  { %v41_v14 = vadd.f32 %v40_v13, %v30_v10  ;;  %v59_v17 = vadd.f32 %v58_v15, %v30_v10 }
 0x109   :  { %43 = vst.msk [vmem:[#allocation3] sm:$0x3] %vm42_vm2, %v41_v14 }
 0x10a   :  { %v49_v16 = vpop.xlane.xlu0 %48 }
 0x10b   :  { %v50_v18 = vadd.f32 %v49_v16, %v30_v10 }
 0x10d   :  { %52 = vst.msk [vmem:[#allocation3] sm:$0x3] %vm51_vm3, %v50_v18 }
 0x10e   :  { %61 = vst.msk [vmem:[#allocation3] sm:$0x3] %vm60_vm4, %v59_v17 }
 0x10f   :  { %92 = shalt.err (!%p89_p4)
}
 0x110   :  { %s93_s23 = scalar_lea.hbm %s153_s3, 32 }
 0x111   :  { %p94_p5 = scmp.ne.s32.totalorder %s153_s3, %s93_s23  ;;  %p97_p6 = scmp.lt.u32.totalorder %s93_s23, %s153_s3 }
 0x113   :  { %p99_p7 = pnand %p97_p6, %p94_p5 }
 0x115   :  { %102 = shalt.err (!%p99_p7)
}
 0x116   :  { %71 = dma.vmem_to_hbm [thread:$0]  %s69_s20, 32, %s153_s3, [#allocation4]  }
 0x117   :  { %103 = dma.done.wait [#allocation4], 32  }
 0x118   :  { %104 = vsyncadd [#allocation4], 4294967264 }
 0x119   :  { %75 = vsyncpa [#allocation4], 1 }

</bundles_post_ra>
